<compile_context>
chip_gen: v7x
topology: tpu7x:2x2x1
jax: 0.10.0
libtpu: 0.0.40
codegen_flags: <defaults>
</compile_context>

<pallas_src>
import functools

import numpy as np
import jax
import jax.numpy as jnp
from jax import lax
from jax.experimental import pallas as pl
from jax.experimental.pallas import tpu as pltpu

LEAKY_SLOPE = 0.1
BN_EPS = 1e-5


def _equal_ch_split(c2, groups):
    # Mirrors: i = torch.linspace(0, groups - 1e-6, c2).floor()
    i = np.floor(np.linspace(0.0, groups - 1e-6, c2))
    return [int((i == g).sum()) for g in range(groups)]


def _mixconv_kernel(x_ref, w_ref, o_ref, *, img_w):
    # x_ref: (B, C1, HW)      f32   batch block; channels on sublanes, pixels on lanes
    # w_ref: (3, C2, 3*C1+1)  bf16  per-dy weight slab; BN scale folded into the
    #                               weights, BN shift in the last column of the
    #                               dy=0 slab (matched by the ones row below)
    # o_ref: (B, C2, HW)      f32
    bsz, _, hw = x_ref.shape
    L = bsz * hw

    # Fold the batch into the lane axis: B aligned lane copies (offset b*HW is a
    # multiple of 128), no transpose.  Also reused for the residual add.
    x_comb = jnp.concatenate([x_ref[b] for b in range(bsz)], axis=1)   # (C1, L) f32

    # Horizontal (dx) taps: two lane rolls of the combined strip + column masks.
    # Row boundaries AND image boundaries both land on (p % W == 0 / W-1), so
    # one mask per direction also kills the cross-image wrap of the roll.
    col = lax.broadcasted_iota(jnp.int32, (1, L), 1) % img_w
    left_ok = col > 0                     # dx = -1 tap valid
    right_ok = col < img_w - 1            # dx = +1 tap valid
    rows_m1 = jnp.where(left_ok, pltpu.roll(x_comb, 1, axis=1), 0.0)       # x[p-1]
    rows_p1 = jnp.where(right_ok, pltpu.roll(x_comb, L - 1, axis=1), 0.0)  # x[p+1]

    # 3-tap dx stack + ones row (folds the BN shift into the dy=0 matmul).
    ones_row = jnp.ones((1, L), dtype=x_comb.dtype)
    stacked = jnp.concatenate([rows_m1, x_comb, rows_p1, ones_row], axis=0)
    stacked = stacked.astype(w_ref.dtype)          # bf16 operands, f32 accumulation

    # One small matmul per dy (MXU has huge slack; the win is dropping the
    # 9-tap im2col shuffle).  K = 3*C1+1, N = B*HW lanes.
    z_m1 = jnp.dot(w_ref[0], stacked, preferred_element_type=jnp.float32)  # dy = -1
    z_0 = jnp.dot(w_ref[1], stacked, preferred_element_type=jnp.float32)   # dy =  0
    z_p1 = jnp.dot(w_ref[2], stacked, preferred_element_type=jnp.float32)  # dy = +1

    # Vertical (dy) taps via output-side rolls by +-W; the top/bottom row masks
    # also cover the cross-image wrap (those lanes are exactly the masked ones).
    pix = lax.broadcasted_iota(jnp.int32, (1, L), 1) % hw
    top_ok = pix >= img_w                 # output row > 0    -> dy=-1 contributes
    bot_ok = pix < hw - img_w             # output row < H-1  -> dy=+1 contributes
    y = z_0
    y = y + jnp.where(top_ok, pltpu.roll(z_m1, img_w, axis=1), 0.0)
    y = y + jnp.where(bot_ok, pltpu.roll(z_p1, L - img_w, axis=1), 0.0)

    y = jnp.maximum(y, LEAKY_SLOPE * y)   # LeakyReLU(0.1): mul + max, no select
    out = x_comb + y                      # residual (C1 == C2), f32

    # Lane-dense writeback: aligned 256-lane slabs per image.
    for b in range(bsz):
        o_ref[b] = out[:, b * hw:(b + 1) * hw].astype(o_ref.dtype)


@functools.partial(jax.jit, static_argnames=("images_per_block",))
def mixconv2d(x, w1, w3, gamma, beta, run_mean, run_var, *, images_per_block=None):
    """MixConv2d forward (eval-mode BN).

    x:  (N, C1, H, W) float32, NCHW (same as PyTorch)
    w1: (c0, C1, 1, 1) 1x1 conv weight (OIHW, bias=False)
    w3: (c3, C1, 3, 3) 3x3 conv weight (OIHW, bias=False)
    gamma/beta/run_mean/run_var: (C2,) BatchNorm2d parameters / running stats
    returns (N, C2, H, W)
    """
    n, c1, h, w = x.shape
    c0 = w1.shape[0]
    c3 = w3.shape[0]
    c2 = c0 + c3
    if c2 != c1:
        raise ValueError(f"residual add requires c1 == c2, got c1={c1}, c2={c2}")
    hw = h * w

    if images_per_block is None:
        images_per_block = n          # whole batch in one grid step (see header)
    if n % images_per_block != 0:
        raise ValueError(f"images_per_block={images_per_block} must divide N={n}")

    # Fold BatchNorm (eval mode) into per-channel scale / shift.
    scale = gamma / jnp.sqrt(run_var + BN_EPS)              # (C2,)
    shift = beta - run_mean * scale                         # (C2,)

    # Per-dy weight slabs (3, C2, 3*C1+1); tap order along K is
    # [dx=-1 | dx=0 | dx=+1 | ones], matching the kernel's dx stack.
    kk = 3 * c1 + 1
    # w3[o, i, ky, kx] -> wcomb[ky, c0+o, kx*C1 + i]
    w3_t = jnp.transpose(w3, (2, 0, 3, 1)).reshape(3, c3, 3 * c1)
    wcomb = jnp.zeros((3, c2, kk), jnp.float32)
    wcomb = wcomb.at[:, c0:, :3 * c1].set(w3_t)                   # 3x3 branch
    wcomb = wcomb.at[1, :c0, c1:2 * c1].set(w1.reshape(c0, c1))   # 1x1 branch (centre tap)
    wcomb = wcomb * scale[None, :, None]                          # fold BN scale
    wcomb = wcomb.at[1, :, 3 * c1].set(shift)                     # fold BN shift (ones row)
    wcomb = wcomb.astype(jnp.bfloat16)                            # bf16 operands

    x2 = x.reshape(n, c1, hw)                                     # free (contiguous)

    out2 = pl.pallas_call(
        functools.partial(_mixconv_kernel, img_w=w),
        out_shape=jax.ShapeDtypeStruct((n, c2, hw), x.dtype),
        grid=(n // images_per_block,),
        in_specs=[
            pl.BlockSpec((images_per_block, c1, hw), lambda i: (i, 0, 0)),
            pl.BlockSpec((3, c2, kk), lambda i: (0, 0, 0)),       # weights (resident)
        ],
        out_specs=pl.BlockSpec((images_per_block, c2, hw), lambda i: (i, 0, 0)),
        # x and out share shape/dtype (residual => C1 == C2): reuse the input's
        # HBM buffer for the output instead of allocating a second one.
        input_output_aliases={0: 0},
        compiler_params=pltpu.CompilerParams(
            dimension_semantics=("parallel",)),
    )(x2, wcomb)

    return out2.reshape(n, c2, h, w)


def mixconv2d_reference(x, w1, w3, gamma, beta, run_mean, run_var):
    """Pure-JAX reference (lax.conv) for numerical validation."""
    dn = ('NCHW', 'OIHW', 'NCHW')
    y0 = lax.conv_general_dilated(x, w1, (1, 1), 'SAME', dimension_numbers=dn)
    y1 = lax.conv_general_dilated(x, w3, (1, 1), 'SAME', dimension_numbers=dn)
    y = jnp.concatenate([y0, y1], axis=1)
    scale = gamma / jnp.sqrt(run_var + BN_EPS)
    shift = beta - run_mean * scale
    y = y * scale[None, :, None, None] + shift[None, :, None, None]
    y = jnp.where(y > 0, y, LEAKY_SLOPE * y)
    return x + y


if __name__ == "__main__":
    # MixConv2d(c1=4, c2=4, k=(1,3), s=1, equal_ch=True); residual requires c1==c2.
    c1_in, c2_out = 4, 4
    ks = (1, 3)
    c_split = _equal_ch_split(c2_out, len(ks))        # -> [2, 2]
    c0, c3 = c_split

    N, H, W = 2, 16, 16
    key = jax.random.PRNGKey(0)
    k_x, k_w1, k_w3, k_g, k_b, k_m, k_v = jax.random.split(key, 7)

    x = jax.random.normal(k_x, (N, c1_in, H, W), dtype=jnp.float32)

    # Conv weights (bias=False), OIHW like PyTorch.
    w1 = 0.1 * jax.random.normal(k_w1, (c0, c1_in, 1, 1), dtype=jnp.float32)
    w3 = 0.1 * jax.random.normal(k_w3, (c3, c1_in, 3, 3), dtype=jnp.float32)

    # BatchNorm2d(c2) parameters + running stats (eval mode).
    gamma = 1.0 + 0.1 * jax.random.normal(k_g, (c2_out,), dtype=jnp.float32)
    beta = 0.1 * jax.random.normal(k_b, (c2_out,), dtype=jnp.float32)
    run_mean = 0.1 * jax.random.normal(k_m, (c2_out,), dtype=jnp.float32)
    run_var = 0.5 + jnp.abs(jax.random.normal(k_v, (c2_out,), dtype=jnp.float32))

    out = jax.block_until_ready(
        mixconv2d(x, w1, w3, gamma, beta, run_mean, run_var))
    ref = jax.block_until_ready(
        mixconv2d_reference(x, w1, w3, gamma, beta, run_mean, run_var))

    assert out.shape == (N, c2_out, H, W)
    # Tolerance reflects bf16 conv operands (f32 accumulation, f32 residual path).
    np.testing.assert_allclose(np.asarray(out), np.asarray(ref),
                               rtol=2e-2, atol=2e-2)

    print("KERNEL_OK")
</pallas_src>

<mosaic_0001>
module attributes {stable_mosaic.version = 11 : i64} {
  func.func @_mixconv_kernel(%arg0: i32, %arg1: memref<2x4x256xf32, #tpu.memory_space<vmem>>, %arg2: memref<3x4x13xbf16, #tpu.memory_space<vmem>>, %arg3: memref<2x4x256xf32, #tpu.memory_space<vmem>>) attributes {dimension_semantics = [#tpu.dimension_semantics<parallel>], iteration_bounds = array<i64: 1>, scalar_prefetch = 0 : i64, scratch_operands = 0 : i64, tpu.core_type = #tpu.core_type<tc>, window_params = [{transform_indices = @transform_0, window_bounds = array<i64: 2, 4, 256>}, {pipeline_mode = #tpu.pipeline_mode<synchronous>, transform_indices = @transform_1, window_bounds = array<i64: 3, 4, 13>}, {transform_indices = @transform_2, window_bounds = array<i64: 2, 4, 256>}]} {
    %c0 = arith.constant 0 : index
    %c0_0 = arith.constant 0 : index
    %c0_1 = arith.constant 0 : index
    %0 = vector.load %arg1[%c0, %c0_0, %c0_1] : memref<2x4x256xf32, #tpu.memory_space<vmem>>, vector<1x4x256xf32>
    %1 = vector.shape_cast %0 : vector<1x4x256xf32> to vector<4x256xf32>
    %c1 = arith.constant 1 : index
    %c0_2 = arith.constant 0 : index
    %c0_3 = arith.constant 0 : index
    %2 = vector.load %arg1[%c1, %c0_2, %c0_3] : memref<2x4x256xf32, #tpu.memory_space<vmem>>, vector<1x4x256xf32>
    %3 = vector.shape_cast %2 : vector<1x4x256xf32> to vector<4x256xf32>
    %4 = tpu.concatenate %1, %3 in 1 : vector<4x256xf32>, vector<4x256xf32> -> vector<4x512xf32>
    %5 = tpu.iota {dimensions = array<i32: 1>} : vector<1x512xi32>
    %c16_i32 = arith.constant 16 : i32
    %c0_i32 = arith.constant 0 : i32
    %6 = arith.cmpi eq, %c16_i32, %c0_i32 : i32
    %c1_i32 = arith.constant 1 : i32
    %7 = arith.select %6, %c1_i32, %c16_i32 : i32
    %8 = vector.broadcast %7 : i32 to vector<1x512xi32>
    %9 = arith.remsi %5, %8 : vector<1x512xi32>
    %c0_i32_4 = arith.constant 0 : i32
    %10 = vector.broadcast %c0_i32_4 : i32 to vector<1x512xi32>
    %11 = arith.cmpi ne, %9, %10 : vector<1x512xi32>
    %c0_i32_5 = arith.constant 0 : i32
    %12 = vector.broadcast %c0_i32_5 : i32 to vector<1x512xi32>
    %13 = arith.cmpi slt, %9, %12 : vector<1x512xi32>
    %c0_i32_6 = arith.constant 0 : i32
    %14 = arith.cmpi slt, %7, %c0_i32_6 : i32
    %15 = vector.broadcast %14 : i1 to vector<1x512xi1>
    %16 = vector.broadcast %15 : vector<1x512xi1> to vector<1x512xi1>
    %17 = arith.xori %13, %16 : vector<1x512xi1>
    %18 = arith.andi %17, %11 : vector<1x512xi1>
    %19 = vector.broadcast %7 : i32 to vector<1x512xi32>
    %20 = arith.addi %9, %19 : vector<1x512xi32>
    %21 = arith.select %18, %20, %9 : vector<1x512xi1>, vector<1x512xi32>
    %c0_i32_7 = arith.constant 0 : i32
    %22 = vector.broadcast %c0_i32_7 : i32 to vector<1x512xi32>
    %23 = arith.cmpi sgt, %21, %22 : vector<1x512xi32>
    %c15_i32 = arith.constant 15 : i32
    %24 = vector.broadcast %c15_i32 : i32 to vector<1x512xi32>
    %25 = arith.cmpi slt, %21, %24 : vector<1x512xi32>
    %c1_i32_8 = arith.constant 1 : i32
    %26 = tpu.dynamic_rotate %4 by %c1_i32_8 dim 1 : vector<4x512xf32>, i32 -> vector<4x512xf32>
    %cst = arith.constant 0.000000e+00 : f32
    %27 = vector.shape_cast %23 : vector<1x512xi1> to vector<1x512xi1>
    %28 = vector.broadcast %27 : vector<1x512xi1> to vector<4x512xi1>
    %29 = vector.broadcast %cst : f32 to vector<4x512xf32>
    %30 = arith.select %28, %26, %29 : vector<4x512xi1>, vector<4x512xf32>
    %c511_i32 = arith.constant 511 : i32
    %31 = tpu.dynamic_rotate %4 by %c511_i32 dim 1 : vector<4x512xf32>, i32 -> vector<4x512xf32>
    %cst_9 = arith.constant 0.000000e+00 : f32
    %32 = vector.shape_cast %25 : vector<1x512xi1> to vector<1x512xi1>
    %33 = vector.broadcast %32 : vector<1x512xi1> to vector<4x512xi1>
    %34 = vector.broadcast %cst_9 : f32 to vector<4x512xf32>
    %35 = arith.select %33, %31, %34 : vector<4x512xi1>, vector<4x512xf32>
    %cst_10 = arith.constant 1.000000e+00 : f32
    %36 = vector.broadcast %cst_10 : f32 to vector<1x512xf32>
    %37 = tpu.concatenate %30, %4, %35, %36 in 0 : vector<4x512xf32>, vector<4x512xf32>, vector<4x512xf32>, vector<1x512xf32> -> vector<13x512xf32>
    %38 = arith.truncf %37 : vector<13x512xf32> to vector<13x512xbf16>
    %c0_11 = arith.constant 0 : index
    %c0_12 = arith.constant 0 : index
    %c0_13 = arith.constant 0 : index
    %39 = vector.load %arg2[%c0_11, %c0_12, %c0_13] : memref<3x4x13xbf16, #tpu.memory_space<vmem>>, vector<1x4x13xbf16>
    %40 = vector.shape_cast %39 : vector<1x4x13xbf16> to vector<4x13xbf16>
    %cst_14 = arith.constant dense<0.000000e+00> : vector<4x512xf32>
    %41 = tpu.matmul %40, %38, %cst_14 {dimension_numbers = #tpu.dot_dimension_numbers<[1], [0], [0], [1], [0, 0, 1, 1], [], []>} : vector<4x13xbf16>, vector<13x512xbf16>, vector<4x512xf32> -> vector<4x512xf32>
    %c1_15 = arith.constant 1 : index
    %c0_16 = arith.constant 0 : index
    %c0_17 = arith.constant 0 : index
    %42 = vector.load %arg2[%c1_15, %c0_16, %c0_17] : memref<3x4x13xbf16, #tpu.memory_space<vmem>>, vector<1x4x13xbf16>
    %43 = vector.shape_cast %42 : vector<1x4x13xbf16> to vector<4x13xbf16>
    %cst_18 = arith.constant dense<0.000000e+00> : vector<4x512xf32>
    %44 = tpu.matmul %43, %38, %cst_18 {dimension_numbers = #tpu.dot_dimension_numbers<[1], [0], [0], [1], [0, 0, 1, 1], [], []>} : vector<4x13xbf16>, vector<13x512xbf16>, vector<4x512xf32> -> vector<4x512xf32>
    %c2 = arith.constant 2 : index
    %c0_19 = arith.constant 0 : index
    %c0_20 = arith.constant 0 : index
    %45 = vector.load %arg2[%c2, %c0_19, %c0_20] : memref<3x4x13xbf16, #tpu.memory_space<vmem>>, vector<1x4x13xbf16>
    %46 = vector.shape_cast %45 : vector<1x4x13xbf16> to vector<4x13xbf16>
    %cst_21 = arith.constant dense<0.000000e+00> : vector<4x512xf32>
    %47 = tpu.matmul %46, %38, %cst_21 {dimension_numbers = #tpu.dot_dimension_numbers<[1], [0], [0], [1], [0, 0, 1, 1], [], []>} : vector<4x13xbf16>, vector<13x512xbf16>, vector<4x512xf32> -> vector<4x512xf32>
    %48 = tpu.iota {dimensions = array<i32: 1>} : vector<1x512xi32>
    %c256_i32 = arith.constant 256 : i32
    %c0_i32_22 = arith.constant 0 : i32
    %49 = arith.cmpi eq, %c256_i32, %c0_i32_22 : i32
    %c1_i32_23 = arith.constant 1 : i32
    %50 = arith.select %49, %c1_i32_23, %c256_i32 : i32
    %51 = vector.broadcast %50 : i32 to vector<1x512xi32>
    %52 = arith.remsi %48, %51 : vector<1x512xi32>
    %c0_i32_24 = arith.constant 0 : i32
    %53 = vector.broadcast %c0_i32_24 : i32 to vector<1x512xi32>
    %54 = arith.cmpi ne, %52, %53 : vector<1x512xi32>
    %c0_i32_25 = arith.constant 0 : i32
    %55 = vector.broadcast %c0_i32_25 : i32 to vector<1x512xi32>
    %56 = arith.cmpi slt, %52, %55 : vector<1x512xi32>
    %c0_i32_26 = arith.constant 0 : i32
    %57 = arith.cmpi slt, %50, %c0_i32_26 : i32
    %58 = vector.broadcast %57 : i1 to vector<1x512xi1>
    %59 = vector.broadcast %58 : vector<1x512xi1> to vector<1x512xi1>
    %60 = arith.xori %56, %59 : vector<1x512xi1>
    %61 = arith.andi %60, %54 : vector<1x512xi1>
    %62 = vector.broadcast %50 : i32 to vector<1x512xi32>
    %63 = arith.addi %52, %62 : vector<1x512xi32>
    %64 = arith.select %61, %63, %52 : vector<1x512xi1>, vector<1x512xi32>
    %c16_i32_27 = arith.constant 16 : i32
    %65 = vector.broadcast %c16_i32_27 : i32 to vector<1x512xi32>
    %66 = arith.cmpi sge, %64, %65 : vector<1x512xi32>
    %c240_i32 = arith.constant 240 : i32
    %67 = vector.broadcast %c240_i32 : i32 to vector<1x512xi32>
    %68 = arith.cmpi slt, %64, %67 : vector<1x512xi32>
    %c16_i32_28 = arith.constant 16 : i32
    %69 = tpu.dynamic_rotate %41 by %c16_i32_28 dim 1 : vector<4x512xf32>, i32 -> vector<4x512xf32>
    %cst_29 = arith.constant 0.000000e+00 : f32
    %70 = vector.shape_cast %66 : vector<1x512xi1> to vector<1x512xi1>
    %71 = vector.broadcast %70 : vector<1x512xi1> to vector<4x512xi1>
    %72 = vector.broadcast %cst_29 : f32 to vector<4x512xf32>
    %73 = arith.select %71, %69, %72 : vector<4x512xi1>, vector<4x512xf32>
    %74 = arith.addf %44, %73 : vector<4x512xf32>
    %c496_i32 = arith.constant 496 : i32
    %75 = tpu.dynamic_rotate %47 by %c496_i32 dim 1 : vector<4x512xf32>, i32 -> vector<4x512xf32>
    %cst_30 = arith.constant 0.000000e+00 : f32
    %76 = vector.shape_cast %68 : vector<1x512xi1> to vector<1x512xi1>
    %77 = vector.broadcast %76 : vector<1x512xi1> to vector<4x512xi1>
    %78 = vector.broadcast %cst_30 : f32 to vector<4x512xf32>
    %79 = arith.select %77, %75, %78 : vector<4x512xi1>, vector<4x512xf32>
    %80 = arith.addf %74, %79 : vector<4x512xf32>
    %cst_31 = arith.constant 1.000000e-01 : f32
    %81 = vector.broadcast %cst_31 : f32 to vector<4x512xf32>
    %82 = arith.mulf %81, %80 : vector<4x512xf32>
    %83 = arith.maximumf %80, %82 : vector<4x512xf32>
    %84 = arith.addf %4, %83 : vector<4x512xf32>
    %85 = vector.extract_strided_slice %84 {offsets = [0, 0], sizes = [4, 256], strides = [1, 1]} : vector<4x512xf32> to vector<4x256xf32>
    %c0_32 = arith.constant 0 : index
    %c0_33 = arith.constant 0 : index
    %c0_34 = arith.constant 0 : index
    %86 = vector.load %arg3[%c0_32, %c0_33, %c0_34] : memref<2x4x256xf32, #tpu.memory_space<vmem>>, vector<1x4x256xf32>
    %87 = vector.shape_cast %86 : vector<1x4x256xf32> to vector<4x256xf32>
    %88 = vector.shape_cast %85 : vector<4x256xf32> to vector<1x4x256xf32>
    tpu.vector_store %arg3[%c0_32, %c0_33, %c0_34], %88 {strides = array<i32>} : memref<2x4x256xf32, #tpu.memory_space<vmem>>, vector<1x4x256xf32>,
    %89 = vector.extract_strided_slice %84 {offsets = [0, 256], sizes = [4, 256], strides = [1, 1]} : vector<4x512xf32> to vector<4x256xf32>
    %c1_35 = arith.constant 1 : index
    %c0_36 = arith.constant 0 : index
    %c0_37 = arith.constant 0 : index
    %90 = vector.load %arg3[%c1_35, %c0_36, %c0_37] : memref<2x4x256xf32, #tpu.memory_space<vmem>>, vector<1x4x256xf32>
    %91 = vector.shape_cast %90 : vector<1x4x256xf32> to vector<4x256xf32>
    %92 = vector.shape_cast %89 : vector<4x256xf32> to vector<1x4x256xf32>
    tpu.vector_store %arg3[%c1_35, %c0_36, %c0_37], %92 {strides = array<i32>} : memref<2x4x256xf32, #tpu.memory_space<vmem>>, vector<1x4x256xf32>,
    return
  }
  func.func @transform_0(%arg0: i32) -> (i32, i32, i32) {
    %c0_i32 = arith.constant 0 : i32
    %c0_i32_0 = arith.constant 0 : i32
    %c0_i32_1 = arith.constant 0 : i32
    return %arg0, %c0_i32, %c0_i32_0 : i32, i32, i32
  }
  func.func @transform_1(%arg0: i32) -> (i32, i32, i32) {
    %c0_i32 = arith.constant 0 : i32
    %c0_i32_0 = arith.constant 0 : i32
    %c0_i32_1 = arith.constant 0 : i32
    %c0_i32_2 = arith.constant 0 : i32
    return %c0_i32, %c0_i32_0, %c0_i32_1 : i32, i32, i32
  }
  func.func @transform_2(%arg0: i32) -> (i32, i32, i32) {
    %c0_i32 = arith.constant 0 : i32
    %c0_i32_0 = arith.constant 0 : i32
    %c0_i32_1 = arith.constant 0 : i32
    return %arg0, %c0_i32, %c0_i32_0 : i32, i32, i32
  }
}

</mosaic_0001>

<bundles_post_ra>
// kernel: mixconv2d.1
= control target key start
LH: loop header
LB: loop body
LE: loop exit
PB: predicated region body
PF: predicated region fallthrough
CT: control target
= control target key end

     0   :  { %s605_s13 = smov 127   ;;  %s606_s14 = smov 1   ;;  %v607_v6 = vmov 0   ;;  %v21_v7 = vlaneseq  ;;  %vm158_vm0 = vcmask 1045504   ;;  %vm159_vm3 = vcmask 1046528   ;;  %s793_s0 = inlined_call_operand.vmem [shape: f32[2,4,256], index: 0, kind: input, shape index: {}, may-alias: {0,2}]   ;;  %s794_s1 = inlined_call_operand.vmem [shape: bf16[3,4,13], index: 1, kind: input, shape index: {}]   ;;  %s795_s2 = inlined_call_operand.vmem [shape: f32[2,4,256], index: 2, kind: output, shape index: {}, may-alias: {0,2}]  }
   0x1   :  { %v629_v0 = vld [vmem:[%s793_s0] sm:$0xff]  ;;  %v634_v1 = vld [vmem:[%s793_s0 + $0x8] sm:$0xff]  ;;  %206 = vmatprep.mubr.bf16.mxu0 %v607_v6  ;;  %247 = vmatprep.mubr.bf16.mxu1 %v607_v6  ;;  %v608_v14 = vmov 65535   ;;  %vm140_vm7 = vcmask 1043456   ;;  %vm154_vm13 = vcmask 105472   ;;  %s609_s20 = smov 16  }
   0x2   :  { %v638_v2 = vcombine.high %v629_v0, %v629_v0  ;;  %v642_v3 = vcombine.high %v634_v1, %v634_v1  ;;  %v650_v8 = vand.u32 127, %v21_v7  ;;  %v160_v15 = vsel %vm158_vm0, 4294967295, %v608_v14  ;;  %v153_v18 = vld [vmem:[%s794_s1] sm:$0x3] }
   0x3   :  { %v132_v27 = vrot.slane %v629_v0, 4  ;;  %v134_v28 = vrot.slane %v634_v1, 4  ;;  %v161_v32 = vsel %vm159_vm3, %v160_v15, 0 }
   0x4   :  { %v593_v4 = vpack.i.bf16 %v638_v2, %v629_v0  ;;  %v598_v5 = vpack.i.bf16 %v642_v3, %v634_v1  ;;  %v653_v9 = vadd.s32 128, %v650_v8  ;;  %v30_v10 = vand.u32 15, %v650_v8 }
   0x5   :  { %v658_v12 = vadd.s32 256, %v650_v8  ;;  %v661_v13 = vadd.s32 384, %v650_v8  ;;  %vm115_vm1 = vcmp.lt.s32.totalorder %v650_v8, 127  ;;  %vm90_vm2 = vcmp.lt.s32.totalorder %v650_v8, 1 }
   0x6   :  { %594 = vrot.lane.b32.xlu1 %v593_v4, %s605_s13  ;;  %584 = vrot.lane.b32.xlu0 %v593_v4, %s606_s14  ;;  %v37_v11 = vand.u32 15, %v653_v9  ;;  %vm665_vm4 = vcmp.lt.s32.totalorder %v30_v10, 15  ;;  %vm675_vm6 = vcmp.gt.s32.totalorder %v30_v10, 0  ;;  %vm409_vm15 = vcmp.lt.s32.totalorder %v650_v8, 16 }
   0x7   :  { %v44_v20 = vand.u32 15, %v658_v12  ;;  %v51_v21 = vand.u32 15, %v661_v13 }
   0x8   :  { %vm669_vm5 = vcmp.gt.s32.totalorder %v37_v11, 0  ;;  %vm685_vm8 = vcmp.lt.s32.totalorder %v37_v11, 15 }
   0x9   :  { %vm694_vm9 = vcmp.lt.s32.totalorder %v44_v20, 15  ;;  %vm698_vm10 = vcmp.lt.s32.totalorder %v51_v21, 15  ;;  %vm702_vm11 = vcmp.gt.s32.totalorder %v44_v20, 0  ;;  %vm706_vm12 = vcmp.gt.s32.totalorder %v51_v21, 0  ;;  %v570_v20 = vld [vmem:[%s794_s1 + $0x2] sm:$0x3] }
   0xa   :  { %599 = vrot.lane.b32.xlu1 %v598_v5, %s605_s13  ;;  %589 = vrot.lane.b32.xlu0 %v598_v5, %s606_s14 }
  0x78   :  { %v595_v17 = vpop.permute.xlu1 %594  ;;  %v585_v19 = vpop.permute.xlu0 %584 }
  0x79   :  { %v597_v22 = vunpack.i.h.bf16 %v595_v17  ;;  %v596_v23 = vunpack.i.l.bf16 %v595_v17  ;;  %v587_v24 = vunpack.i.h.bf16 %v585_v19  ;;  %v586_v25 = vunpack.i.l.bf16 %v585_v19  ;;  %v571_v19 = vld [vmem:[%s794_s1 + $0x4] sm:$0x3]  ;;  %s610_s1 = smov 112  }
  0x7b   :  { %v118_v29 = vsel %vm115_vm1, %v596_v23, %v597_v22  ;;  %v93_v30 = vsel %vm90_vm2, %v586_v25, %v587_v24 }
  0x7c   :  { %v128_v33 = vsel %vm665_vm4, %v118_v29, 0.0  ;;  %v104_v34 = vsel %vm669_vm5, %v93_v30, 0.0  ;;  %v600_v37 = vpop.permute.xlu1 %599  ;;  %v590_v38 = vpop.permute.xlu0 %589 }
  0x7d   :  { %v602_v39 = vunpack.i.h.bf16 %v600_v37  ;;  %v601_v40 = vunpack.i.l.bf16 %v600_v37  ;;  %v592_v41 = vunpack.i.h.bf16 %v590_v38  ;;  %v591_v42 = vunpack.i.l.bf16 %v590_v38 }
  0x7e   :  { %v142_v45 = vsel %vm140_vm7, %v104_v34, %v638_v2  ;;  %v145_v46 = vsel %vm140_vm7, %v128_v33, 1.0 }
  0x7f   :  { %v116_v47 = vsel %vm115_vm1, %v601_v40, %v602_v39  ;;  %v117_v48 = vsel %vm115_vm1, %v597_v22, %v601_v40  ;;  %v119_v49 = vsel %vm115_vm1, %v602_v39, %v596_v23  ;;  %v91_v50 = vsel %vm90_vm2, %v591_v42, %v592_v41 }
  0x80   :  { %v129_v51 = vsel %vm685_vm8, %v117_v48, 0.0  ;;  %v130_v52 = vsel %vm694_vm9, %v116_v47, 0.0  ;;  %v131_v53 = vsel %vm698_vm10, %v119_v49, 0.0  ;;  %v92_v54 = vsel %vm90_vm2, %v587_v24, %v591_v42 }
  0x81   :  { %v94_v55 = vsel %vm90_vm2, %v592_v41, %v586_v25  ;;  %v105_v56 = vsel %vm702_vm11, %v92_v54, 0.0  ;;  %v106_v57 = vsel %vm706_vm12, %v91_v50, 0.0  ;;  %v146_v58 = vsel %vm140_vm7, %v129_v51, 1.0 }
  0x82   :  { %v103_v59 = vsel %vm675_vm6, %v94_v55, 0.0  ;;  %v150_v60 = vpack.c.bf16 %v146_v58, %v142_v45  ;;  %v144_v61 = vsel %vm140_vm7, %v106_v57, %v642_v3  ;;  %v148_v62 = vsel %vm140_vm7, %v131_v53, 1.0 }
  0x83   :  { %v152_v63 = vpack.c.bf16 %v148_v62, %v144_v61  ;;  %v141_v4 = vsel %vm140_vm7, %v103_v59, %v132_v27  ;;  %v143_v5 = vsel %vm140_vm7, %v105_v56, %v134_v28  ;;  %v147_v7 = vsel %vm140_vm7, %v130_v52, 1.0 }
  0x84   :  { %v166_v10 = vand.u32 %v161_v32, %v150_v60  ;;  %v149_v11 = vpack.c.bf16 %v145_v46, %v141_v4  ;;  %v151_v14 = vpack.c.bf16 %v147_v7, %v143_v5  ;;  %v349_v45 = vand.u32 255, %v650_v8 }
  0x85   :  { %v172_v15 = vand.u32 %v161_v32, %v152_v63  ;;  %v363_v47 = vand.u32 255, %v658_v12  ;;  %vm519_vm1 = vcmp.lt.s32.totalorder %v650_v8, 112  ;;  %v356_v54 = vand.u32 255, %v653_v9 }
  0x86   :  { %174 = vmatprep.subr.bf16.mxu0 %v166_v10  ;;  %v163_v16 = vand.u32 %v161_v32, %v149_v11  ;;  %v169_v17 = vand.u32 %v161_v32, %v151_v14  ;;  %vm393_vm14 = vcmp.ge.s32.totalorder %v349_v45, 16  ;;  %v370_v12 = vand.u32 255, %v661_v13 }
  0x87   :  { %215 = vmatprep.subr.bf16.mxu1 %v172_v15  ;;  %vm766_vm0 = vcmp.ge.s32.totalorder %v363_v47, 16  ;;  %vm398_vm2 = vcmp.lt.s32.totalorder %v356_v54, 240 }
  0x88   :  { %175 = vmatpush1.bf16.msra.mxu0 %v163_v16  ;;  %216 = vmatpush1.bf16.msra.mxu1 %v169_v17  ;;  %vm400_vm3 = vcmp.lt.s32.totalorder %v370_v12, 240 }
  0x89   :  { %263 = vmatprep.subr.bf16.mxu0 %v166_v10  ;;  %304 = vmatprep.subr.bf16.mxu1 %v172_v15 }
  0x8b   :  { %568 = vmatmul.mubr.msk.bf16.vlgmr.msra.gmra.mrb[0].mxu0 %vm154_vm13, %v153_v18  ;;  %569 = vmatmul.mubr.msk.bf16.vlgmr.msra.gmra.mrb[0].mxu1 %vm154_vm13, %v153_v18 }
  0x8c   :  { %264 = vmatpush1.bf16.msra.mxu0 %v163_v16  ;;  %305 = vmatpush1.bf16.msra.mxu1 %v169_v17 }
  0x8d   :  { %429 = vmatprep.subr.bf16.mxu0 %v166_v10  ;;  %470 = vmatprep.subr.bf16.mxu1 %v172_v15 }
  0x8e   :  { %295 = vmatprep.mubr.bf16.mxu0 %v607_v6  ;;  %336 = vmatprep.mubr.bf16.mxu1 %v607_v6 }
  0x93   :  { %572 = vmatmul.mubr.msk.bf16.vlgmr.msra.gmra.mrb[4].mxu0 %vm154_vm13, %v571_v19  ;;  %573 = vmatmul.mubr.msk.bf16.vlgmr.msra.gmra.mrb[4].mxu1 %vm154_vm13, %v571_v19 }
  0x94   :  { %430 = vmatpush1.bf16.msra.mxu0 %v163_v16  ;;  %471 = vmatpush1.bf16.msra.mxu1 %v169_v17 }
  0x95   :  { %461 = vmatprep.mubr.bf16.mxu0 %v607_v6  ;;  %502 = vmatprep.mubr.bf16.mxu1 %v607_v6 }
  0x9b   :  { %574 = vmatmul.mubr.msk.bf16.vlgmr.msra.gmra.mrb[8].mxu0 %vm154_vm13, %v570_v20  ;;  %575 = vmatmul.mubr.msk.bf16.vlgmr.msra.gmra.mrb[8].mxu1 %vm154_vm13, %v570_v20 }
 0x15e   :  { %v208_v21 = vpop.f32.mrb[0].mxu0  ;;  %v249_v22 = vpop.f32.mrb[0].mxu1 }
 0x15f   :  { %401 = vrot.lane.b32.xlu0 %v208_v21, %s609_s20  ;;  %v210_v23 = vpop.f32.mrb[1].mxu0  ;;  %v251_v24 = vpop.f32.mrb[1].mxu1 }
 0x160   :  { %403 = vrot.lane.b32.xlu1 %v210_v23, %s609_s20  ;;  %v212_v25 = vpop.f32.mrb[2].mxu0  ;;  %v253_v26 = vpop.f32.mrb[2].mxu1 }
 0x161   :  { %v213_v27 = vpop.f32.mrb[3].mxu0  ;;  %v254_v28 = vpop.f32.mrb[3].mxu1 }
 0x163   :  { %405 = vrot.lane.b32.xlu0 %v249_v22, %s609_s20 }
 0x164   :  { %407 = vrot.lane.b32.xlu1 %v251_v24, %s609_s20 }
 0x166   :  { %v297_v6 = vpop.f32.mrb[4].mxu0  ;;  %v338_v29 = vpop.f32.mrb[4].mxu1 }
 0x167   :  { %511 = vrot.lane.b32.xlu0 %v297_v6, %s610_s1  ;;  %v299_v30 = vpop.f32.mrb[5].mxu0  ;;  %v340_v31 = vpop.f32.mrb[5].mxu1 }
 0x168   :  { %513 = vrot.lane.b32.xlu1 %v299_v30, %s610_s1  ;;  %v301_v32 = vpop.f32.mrb[6].mxu0  ;;  %v342_v33 = vpop.f32.mrb[6].mxu1 }
 0x169   :  { %v302_v34 = vpop.f32.mrb[7].mxu0  ;;  %v343_v35 = vpop.f32.mrb[7].mxu1 }
 0x16b   :  { %515 = vrot.lane.b32.xlu0 %v338_v29, %s610_s1 }
 0x16c   :  { %517 = vrot.lane.b32.xlu1 %v340_v31, %s610_s1 }
 0x16e   :  { %v463_v36 = vpop.f32.mrb[8].mxu0  ;;  %v504_v37 = vpop.f32.mrb[8].mxu1 }
 0x16f   :  { %v465_v38 = vpop.f32.mrb[9].mxu0  ;;  %v506_v39 = vpop.f32.mrb[9].mxu1 }
 0x170   :  { %v508_v40 = vpop.f32.mrb[10].mxu1  ;;  %v467_v41 = vpop.f32.mrb[10].mxu0 }
 0x171   :  { %v509_v42 = vpop.f32.mrb[11].mxu1  ;;  %v468_v43 = vpop.f32.mrb[11].mxu0 }
 0x1d1   :  { %v402_v44 = vpop.permute.xlu0 %401 }
 0x1d2   :  { %v404_v46 = vpop.permute.xlu1 %403 }
 0x1d3   :  { %v412_v58 = vsel %vm409_vm15, %v402_v44, %v404_v46 }
 0x1d4   :  { %v466_v4 = vadd.f32 %v465_v38, %v412_v58 }
 0x1d5   :  { %v406_v48 = vpop.permute.xlu0 %405 }
 0x1d6   :  { %v408_v49 = vpop.permute.xlu1 %407  ;;  %v411_v52 = vsel %vm409_vm15, %v404_v46, %v406_v48 }
 0x1d7   :  { %v413_v51 = vsel %vm409_vm15, %v408_v49, %v402_v44  ;;  %v424_v59 = vsel %vm766_vm0, %v411_v52, 0.0  ;;  %v410_v61 = vsel %vm409_vm15, %v406_v48, %v408_v49 }
 0x1d8   :  { %v422_v53 = vsel %vm393_vm14, %v413_v51, 0.0  ;;  %v505_v5 = vadd.f32 %v504_v37, %v424_v59  ;;  %v507_v10 = vadd.f32 %v506_v39, %v410_v61 }
 0x1d9   :  { %v464_v55 = vadd.f32 %v463_v36, %v422_v53  ;;  %v512_v56 = vpop.permute.xlu0 %511 }
 0x1da   :  { %v514_v57 = vpop.permute.xlu1 %513 }
 0x1db   :  { %v522_v60 = vsel %vm519_vm1, %v512_v56, %v514_v57 }
 0x1dc   :  { %v536_v62 = vadd.f32 %v522_v60, %v464_v55 }
 0x1dd   :  { %v516_v63 = vpop.permute.xlu0 %515 }
 0x1de   :  { %v540_v9 = vmul.f32 0.1, %v536_v62  ;;  %v521_v7 = vsel %vm519_vm1, %v514_v57, %v516_v63  ;;  %v518_v13 = vpop.permute.xlu1 %517 }
 0x1df   :  { %v533_v11 = vsel %vm398_vm2, %v521_v7, 0.0  ;;  %v520_v14 = vsel %vm519_vm1, %v516_v63, %v518_v13  ;;  %v523_v15 = vsel %vm519_vm1, %v518_v13, %v512_v56 }
 0x1e0   :  { %v537_v16 = vadd.f32 %v533_v11, %v466_v4  ;;  %v535_v17 = vsel %vm400_vm3, %v523_v15, 0.0  ;;  %v538_v18 = vadd.f32 %v520_v14, %v505_v5  ;;  %v544_v20 = vmax.f32 %v536_v62, %v540_v9 }
 0x1e1   :  { %v539_v19 = vadd.f32 %v535_v17, %v507_v10 }
 0x1e2   :  { %v541_v21 = vmul.f32 0.1, %v537_v16  ;;  %v542_v22 = vmul.f32 0.1, %v538_v18  ;;  %v548_v27 = vadd.f32 %v544_v20, %v629_v0 }
 0x1e3   :  { %v543_v23 = vmul.f32 0.1, %v539_v19 }
 0x1e4   :  { %v545_v24 = vmax.f32 %v537_v16, %v541_v21  ;;  %v546_v25 = vmax.f32 %v538_v18, %v542_v22 }
 0x1e5   :  { %v547_v26 = vmax.f32 %v539_v19, %v543_v23 }
 0x1e6   :  { %v549_v28 = vadd.f32 %v545_v24, %v638_v2  ;;  %v550_v6 = vadd.f32 %v634_v1, %v546_v25 }
 0x1e7   :  { %v551_v8 = vadd.f32 %v547_v26, %v642_v3 }
 0x1e8   :  { %v554_v29 = vcombine.low %v548_v27, %v549_v28 }
 0x1e9   :  { %v559_v30 = vcombine.low %v550_v6, %v551_v8 }
 0x1ea   :  { %556 = vst [vmem:[%s795_s2] sm:$0xff] %v554_v29 }
 0x1eb   :  { %576 = vst [vmem:[%s795_s2 + $0x8] sm:$0xff] %v559_v30 }

</bundles_post_ra>
